<compile_context>
chip_gen: v5e
topology: v5e:2x2
jax: 0.10.0
libtpu: 0.0.40
codegen_flags: <defaults>
</compile_context>

<pallas_src>
import functools

import jax
import jax.numpy as jnp
from jax.experimental import pallas as pl
from jax.experimental.pallas import tpu as pltpu

FEATURE_DIM = 512          # fixed by nn.Linear(512, num_class)
SUBLANE = 8                # TPU sublane rows for 32-bit dtypes
VMEM_TILE_BUDGET = 12 * 1024 * 1024  # bytes for double-buffered feat+out tiles


def _round_up(x, m):
    return ((x + m - 1) // m) * m


def _fc_kernel(feat_ref, w_ref, b_ref, out_ref):
    """Fused flatten+fc hot path: out = feat @ W + b on the MXU.

    feat_ref: (TB, 512)        VMEM tile of flattened encoder features
    w_ref:    (512, num_class) full weight (VMEM-resident across steps)
    b_ref:    (1, num_class)   bias row, f32 (VMEM-resident across steps)
    out_ref:  (TB, num_class)  logits tile, f32
    """
    acc = jnp.dot(feat_ref[...], w_ref[...], preferred_element_type=jnp.float32)
    out_ref[...] = (acc + b_ref[...]).astype(out_ref.dtype)


@functools.partial(jax.jit, static_argnames=("block_b",))
def net_forward(x, fc_weight_t, fc_bias, *, block_b=1024):
    """Forward pass of Net (minus the external encoder, see TODO above).

    x:           [B, 512, 1, 1]  encoder output (NCHW); any float dtype
    fc_weight_t: [512, num_class] (PyTorch fc.weight transposed)
    fc_bias:     [num_class]
    returns:     [B, num_class] float32 logits
    """
    B = x.shape[0]
    num_class = fc_weight_t.shape[1]

    # Glue (plain JAX, layout no-op): torch.flatten(x, start_dim=1)
    feature = x.reshape(B, -1)  # [B, 512], row-major == torch.flatten semantics
    assert feature.shape[1] == FEATURE_DIM, feature.shape

    compute_dtype = feature.dtype
    itemsize = jnp.dtype(compute_dtype).itemsize
    # Sublane granularity: 8 rows for 32-bit, 16 for 16-bit, 32 for 8-bit.
    sub = max(SUBLANE, 32 // itemsize)

    # ---- batch-tile selection (all static) -----------------------------------
    # Cap so double-buffered feature + output tiles stay within the VMEM budget
    # (weight/bias are tiny and resident, so they barely count).
    bytes_per_row = 2 * (FEATURE_DIM * itemsize + num_class * 4)
    vmem_cap = max(sub, (VMEM_TILE_BUDGET // bytes_per_row) // sub * sub)

    tb = min(block_b, vmem_cap)
    # Guarantee >= 2 grid steps when possible so the "parallel" batch axis
    # engages both TensorCores on v7x (harmless no-op on v5e/v6e).
    tb = min(tb, _round_up(-(-B // 2), sub))
    tb = max(sub, (tb // sub) * sub)

    grid = (pl.cdiv(B, tb),)  # ragged last tile handled by Pallas OOB masking

    w = fc_weight_t.astype(compute_dtype)  # 512*num_class elems -> negligible
    bias_row = fc_bias.astype(jnp.float32).reshape(1, num_class)

    cost = pl.CostEstimate(
        flops=2 * B * FEATURE_DIM * num_class,
        transcendentals=0,
        bytes_accessed=(B * FEATURE_DIM * itemsize        # features
                        + FEATURE_DIM * num_class * itemsize  # weight
                        + num_class * 4                   # bias
                        + B * num_class * 4),             # output
    )

    return pl.pallas_call(
        _fc_kernel,
        out_shape=jax.ShapeDtypeStruct((B, num_class), jnp.float32),
        grid_spec=pltpu.PrefetchScalarGridSpec(
            num_scalar_prefetch=0,
            grid=grid,
            in_specs=[
                # batch-tiled features
                pl.BlockSpec((tb, FEATURE_DIM), lambda i: (i, 0)),
                # full weight / bias: block index never changes -> stays
                # resident in VMEM across grid steps (no re-DMA).
                pl.BlockSpec((FEATURE_DIM, num_class), lambda i: (0, 0)),
                pl.BlockSpec((1, num_class), lambda i: (0, 0)),
            ],
            out_specs=pl.BlockSpec((tb, num_class), lambda i: (i, 0)),
        ),
        compiler_params=pltpu.CompilerParams(
            dimension_semantics=("parallel",),  # megacore-shardable batch axis
        ),
        cost_estimate=cost,
    )(feature, w, bias_row)


def init_fc_params(key, num_class):
    """Deterministic init matching nn.Linear(512, num_class) default scheme:
    U(-1/sqrt(in_features), 1/sqrt(in_features)) for weight and bias."""
    kw, kb = jax.random.split(key)
    bound = 1.0 / jnp.sqrt(jnp.float32(FEATURE_DIM))
    # PyTorch stores weight as [num_class, 512]; we keep the transposed layout.
    weight_t = jax.random.uniform(
        kw, (FEATURE_DIM, num_class), jnp.float32, minval=-bound, maxval=bound
    )
    bias = jax.random.uniform(
        kb, (num_class,), jnp.float32, minval=-bound, maxval=bound
    )
    return weight_t, bias


if __name__ == "__main__":
    key = jax.random.PRNGKey(0)
    k_x, k_p = jax.random.split(key)

    B = 30          # deliberately not a multiple of the batch tile (ragged path)
    num_class = 10  # e.g. CIFAR-10 linear-eval head

    # Encoder output features (stand-in for self.encoder(x)), NCHW [B, 512, 1, 1].
    x = jax.random.normal(k_x, (B, FEATURE_DIM, 1, 1), jnp.float32)
    fc_weight_t, fc_bias = init_fc_params(k_p, num_class)

    out = jax.block_until_ready(net_forward(x, fc_weight_t, fc_bias))
    assert out.shape == (B, num_class), out.shape

    # Pure-JAX reference of the fc semantics (f32 inputs, f32 accumulation).
    ref = x.reshape(B, -1) @ fc_weight_t + fc_bias[None, :]
    assert jnp.allclose(out, ref, atol=2e-2, rtol=2e-2), "mismatch vs reference"

    print("KERNEL_OK")
</pallas_src>

<mosaic_0001>
module attributes {stable_mosaic.version = 11 : i64} {
  func.func @_fc_kernel(%arg0: i32, %arg1: memref<16x512xf32, #tpu.memory_space<vmem>>, %arg2: memref<512x10xf32, #tpu.memory_space<vmem>>, %arg3: memref<1x10xf32, #tpu.memory_space<vmem>>, %arg4: memref<16x10xf32, #tpu.memory_space<vmem>>) attributes {dimension_semantics = [#tpu.dimension_semantics<parallel>], iteration_bounds = array<i64: 2>, scalar_prefetch = 0 : i64, scratch_operands = 0 : i64, tpu.core_type = #tpu.core_type<tc>, window_params = [{transform_indices = @transform_0, window_bounds = array<i64: 16, 512>}, {pipeline_mode = #tpu.pipeline_mode<synchronous>, transform_indices = @transform_1, window_bounds = array<i64: 512, 10>}, {pipeline_mode = #tpu.pipeline_mode<synchronous>, transform_indices = @transform_2, window_bounds = array<i64: 1, 10>}, {transform_indices = @transform_3, window_bounds = array<i64: 16, 10>}]} {
    %c0 = arith.constant 0 : index
    %c0_0 = arith.constant 0 : index
    %0 = vector.load %arg1[%c0, %c0_0] : memref<16x512xf32, #tpu.memory_space<vmem>>, vector<16x512xf32>
    %c0_1 = arith.constant 0 : index
    %c0_2 = arith.constant 0 : index
    %1 = vector.load %arg2[%c0_1, %c0_2] : memref<512x10xf32, #tpu.memory_space<vmem>>, vector<512x10xf32>
    %cst = arith.constant dense<0.000000e+00> : vector<16x10xf32>
    %2 = tpu.matmul %0, %1, %cst {dimension_numbers = #tpu.dot_dimension_numbers<[1], [0], [0], [1], [0, 0, 1, 1], [], []>} : vector<16x512xf32>, vector<512x10xf32>, vector<16x10xf32> -> vector<16x10xf32>
    %c0_3 = arith.constant 0 : index
    %c0_4 = arith.constant 0 : index
    %3 = vector.load %arg3[%c0_3, %c0_4] : memref<1x10xf32, #tpu.memory_space<vmem>>, vector<1x10xf32>
    %4 = vector.broadcast %3 : vector<1x10xf32> to vector<16x10xf32>
    %5 = arith.addf %2, %4 : vector<16x10xf32>
    %c0_5 = arith.constant 0 : index
    %c0_6 = arith.constant 0 : index
    %6 = vector.load %arg4[%c0_5, %c0_6] : memref<16x10xf32, #tpu.memory_space<vmem>>, vector<16x10xf32>
    tpu.vector_store %arg4[%c0_5, %c0_6], %5 {strides = array<i32>} : memref<16x10xf32, #tpu.memory_space<vmem>>, vector<16x10xf32>,
    return
  }
  func.func @transform_0(%arg0: i32) -> (i32, i32) {
    %c0_i32 = arith.constant 0 : i32
    %c0_i32_0 = arith.constant 0 : i32
    return %arg0, %c0_i32 : i32, i32
  }
  func.func @transform_1(%arg0: i32) -> (i32, i32) {
    %c0_i32 = arith.constant 0 : i32
    %c0_i32_0 = arith.constant 0 : i32
    %c0_i32_1 = arith.constant 0 : i32
    return %c0_i32, %c0_i32_0 : i32, i32
  }
  func.func @transform_2(%arg0: i32) -> (i32, i32) {
    %c0_i32 = arith.constant 0 : i32
    %c0_i32_0 = arith.constant 0 : i32
    %c0_i32_1 = arith.constant 0 : i32
    return %c0_i32, %c0_i32_0 : i32, i32
  }
  func.func @transform_3(%arg0: i32) -> (i32, i32) {
    %c0_i32 = arith.constant 0 : i32
    %c0_i32_0 = arith.constant 0 : i32
    return %arg0, %c0_i32 : i32, i32
  }
}

</mosaic_0001>

<bundles_post_ra>
// kernel: net_forward.1
= control target key start
LH: loop header
LB: loop body
LE: loop exit
PB: predicated region body
PF: predicated region fallthrough
CT: control target
= control target key end

     0   :  { %s454_s12 = smov 0   ;;  %s688_s0 = inlined_call_operand.vmem [shape: f32[30,512], index: 0, kind: input, shape index: {}]   ;;  %s689_s1 = inlined_call_operand.vmem [shape: f32[512,10], index: 1, kind: input, shape index: {}]   ;;  %s690_s2 = inlined_call_operand.vmem [shape: f32[1,10], index: 2, kind: input, shape index: {}]   ;;  %s691_s3 = inlined_call_operand.vmem [shape: f32[30,10], index: 3, kind: output, shape index: {}]  }
   0x1 LB: > { %s404_s13 = sadd.s32 4294967295, %s432_s12   ;;  %p408_p0 = scmp.ge.s32.totalorder %s432_s12, 1  ;;  %s432_s12 = sphi %s454_s12, %s13_s12  }
   0x2   : > { %p139_p1 = scmp.lt.s32.totalorder %s432_s12, 3 }
   0x4   : > { %p140_p2 = pnand %p408_p0, %p139_p1 }
   0x5   : > { %s554_s24 = sshll.u32 (!%p140_p2), %s404_s13, 1 }
   0x6   : > { %143 = sbr.rel (%p140_p2) target bundleno = 189 (0xbd), region = 32  ;;  %p165_p3 = scmp.lt.s32.totalorder (!%p140_p2), %s554_s24, 3 }
   0xb   : > { %v232_v0 = vld [vmem:[%s689_s1 + $0x178] sm:$0xff]  ;;  %v231_v2 = vld [vmem:[%s689_s1 + $0x170] sm:$0xff]  ;;  %v230_v6 = vld [vmem:[%s689_s1 + $0x168] sm:$0xff]  ;;  %s693_s24 = smov (!%p165_p3, %s554_s24), 3  ;;  %vm345_vm0 = vcmask 80896  }
   0xc   : > { %v200_v1 = vld [vmem:[%s689_s1 + $0x78] sm:$0xff]  ;;  %299 = vmatpush.msra.mxu2 %v232_v0  ;;  %v199_v4 = vld [vmem:[%s689_s1 + $0x70] sm:$0xff]  ;;  %v198_v8 = vld [vmem:[%s689_s1 + $0x68] sm:$0xff]  ;;  %s416_s18 = sshll.u32 %s693_s24, 5  ;;  %s413_s23 = sshll.u32 %s693_s24, 3 }
   0xd   : > { %253 = vmatpush.msra.mxu0 %v200_v1  ;;  %v248_v3 = vld [vmem:[%s689_s1 + $0x1f8] sm:$0xff]  ;;  %v247_v7 = vld [vmem:[%s689_s1 + $0x1f0] sm:$0xff]  ;;  %v246_v10 = vld [vmem:[%s689_s1 + $0x1e8] sm:$0xff]  ;;  %s650_s6 = scalar_lea.vmem %s688_s0, %s416_s18  ;;  %s175_s27 = scalar_lea.vmem %s691_s3, %s413_s23 }
   0xe   : > { %v216_v5 = vld [vmem:[%s689_s1 + $0xf8] sm:$0xff]  ;;  %322 = vmatpush.msra.mxu3 %v248_v3  ;;  %300 = vmatpush.msra.mxu2 %v231_v2  ;;  %v215_v9 = vld [vmem:[%s689_s1 + $0xf0] sm:$0xff]  ;;  %v229_v11 = vld [vmem:[%s689_s1 + $0x160] sm:$0xff] }
   0xf   : > { %276 = vmatpush.msra.mxu1 %v216_v5  ;;  %254 = vmatpush.msra.mxu0 %v199_v4  ;;  %v197_v12 = vld [vmem:[%s689_s1 + $0x60] sm:$0xff]  ;;  %v214_v13 = vld [vmem:[%s689_s1 + $0xe8] sm:$0xff]  ;;  %v228_v16 = vld [vmem:[%s689_s1 + $0x158] sm:$0xff] }
  0x10   : > { %323 = vmatpush.msra.mxu3 %v247_v7  ;;  %301 = vmatpush.msra.mxu2 %v230_v6  ;;  %v245_v14 = vld [vmem:[%s689_s1 + $0x1e0] sm:$0xff]  ;;  %v196_v17 = vld [vmem:[%s689_s1 + $0x58] sm:$0xff]  ;;  %v227_v20 = vld [vmem:[%s689_s1 + $0x150] sm:$0xff] }
  0x11   : > { %277 = vmatpush.msra.mxu1 %v215_v9  ;;  %255 = vmatpush.msra.mxu0 %v198_v8  ;;  %v213_v15 = vld [vmem:[%s689_s1 + $0xe0] sm:$0xff]  ;;  %v244_v18 = vld [vmem:[%s689_s1 + $0x1d8] sm:$0xff]  ;;  %v195_v21 = vld [vmem:[%s689_s1 + $0x50] sm:$0xff] }
  0x12   : > { %324 = vmatpush.msra.mxu3 %v246_v10  ;;  %302 = vmatpush.msra.mxu2 %v229_v11  ;;  %v212_v19 = vld [vmem:[%s689_s1 + $0xd8] sm:$0xff]  ;;  %v243_v22 = vld [vmem:[%s689_s1 + $0x1d0] sm:$0xff]  ;;  %v226_v24 = vld [vmem:[%s689_s1 + $0x148] sm:$0xff] }
  0x13   : > { %278 = vmatpush.msra.mxu1 %v214_v13  ;;  %256 = vmatpush.msra.mxu0 %v197_v12  ;;  %v211_v23 = vld [vmem:[%s689_s1 + $0xd0] sm:$0xff]  ;;  %v194_v25 = vld [vmem:[%s689_s1 + $0x48] sm:$0xff]  ;;  %v225_v28 = vld [vmem:[%s689_s1 + $0x140] sm:$0xff] }
  0x14   : > { %325 = vmatpush.msra.mxu3 %v245_v14  ;;  %303 = vmatpush.msra.mxu2 %v228_v16  ;;  %v242_v26 = vld [vmem:[%s689_s1 + $0x1c8] sm:$0xff]  ;;  %v193_v29 = vld [vmem:[%s689_s1 + $0x40] sm:$0xff]  ;;  %v224_v32 = vld [vmem:[%s689_s1 + $0x138] sm:$0xff] }
  0x15   : > { %279 = vmatpush.msra.mxu1 %v213_v15  ;;  %257 = vmatpush.msra.mxu0 %v196_v17  ;;  %v210_v27 = vld [vmem:[%s689_s1 + $0xc8] sm:$0xff]  ;;  %v241_v30 = vld [vmem:[%s689_s1 + $0x1c0] sm:$0xff]  ;;  %v192_v33 = vld [vmem:[%s689_s1 + $0x38] sm:$0xff] }
  0x16   : > { %326 = vmatpush.msra.mxu3 %v244_v18  ;;  %304 = vmatpush.msra.mxu2 %v227_v20  ;;  %v209_v31 = vld [vmem:[%s689_s1 + $0xc0] sm:$0xff]  ;;  %v240_v34 = vld [vmem:[%s689_s1 + $0x1b8] sm:$0xff]  ;;  %v223_v36 = vld [vmem:[%s689_s1 + $0x130] sm:$0xff] }
  0x17   : > { %280 = vmatpush.msra.mxu1 %v212_v19  ;;  %258 = vmatpush.msra.mxu0 %v195_v21  ;;  %v208_v35 = vld [vmem:[%s689_s1 + $0xb8] sm:$0xff]  ;;  %v191_v37 = vld [vmem:[%s689_s1 + $0x30] sm:$0xff]  ;;  %v222_v40 = vld [vmem:[%s689_s1 + $0x128] sm:$0xff] }
  0x18   : > { %327 = vmatpush.msra.mxu3 %v243_v22  ;;  %305 = vmatpush.msra.mxu2 %v226_v24  ;;  %v239_v38 = vld [vmem:[%s689_s1 + $0x1b0] sm:$0xff]  ;;  %v190_v41 = vld [vmem:[%s689_s1 + $0x28] sm:$0xff]  ;;  %v221_v44 = vld [vmem:[%s689_s1 + $0x120] sm:$0xff] }
  0x19   : > { %281 = vmatpush.msra.mxu1 %v211_v23  ;;  %259 = vmatpush.msra.mxu0 %v194_v25  ;;  %v207_v39 = vld [vmem:[%s689_s1 + $0xb0] sm:$0xff]  ;;  %v238_v42 = vld [vmem:[%s689_s1 + $0x1a8] sm:$0xff]  ;;  %v189_v45 = vld [vmem:[%s689_s1 + $0x20] sm:$0xff] }
  0x1a   : > { %328 = vmatpush.msra.mxu3 %v242_v26  ;;  %306 = vmatpush.msra.mxu2 %v225_v28  ;;  %v206_v43 = vld [vmem:[%s689_s1 + $0xa8] sm:$0xff]  ;;  %v237_v46 = vld [vmem:[%s689_s1 + $0x1a0] sm:$0xff]  ;;  %v220_v48 = vld [vmem:[%s689_s1 + $0x118] sm:$0xff] }
  0x1b   : > { %282 = vmatpush.msra.mxu1 %v210_v27  ;;  %260 = vmatpush.msra.mxu0 %v193_v29  ;;  %v205_v47 = vld [vmem:[%s689_s1 + $0xa0] sm:$0xff]  ;;  %v188_v49 = vld [vmem:[%s689_s1 + $0x18] sm:$0xff]  ;;  %v219_v52 = vld [vmem:[%s689_s1 + $0x110] sm:$0xff] }
  0x1c   : > { %329 = vmatpush.msra.mxu3 %v241_v30  ;;  %307 = vmatpush.msra.mxu2 %v224_v32  ;;  %v236_v50 = vld [vmem:[%s689_s1 + $0x198] sm:$0xff]  ;;  %v187_v53 = vld [vmem:[%s689_s1 + $0x10] sm:$0xff]  ;;  %v218_v56 = vld [vmem:[%s689_s1 + $0x108] sm:$0xff] }
  0x1d   : > { %283 = vmatpush.msra.mxu1 %v209_v31  ;;  %261 = vmatpush.msra.mxu0 %v192_v33  ;;  %v204_v51 = vld [vmem:[%s689_s1 + $0x98] sm:$0xff]  ;;  %v235_v54 = vld [vmem:[%s689_s1 + $0x190] sm:$0xff]  ;;  %v186_v57 = vld [vmem:[%s689_s1 + $0x8] sm:$0xff] }
  0x1e   : > { %330 = vmatpush.msra.mxu3 %v240_v34  ;;  %308 = vmatpush.msra.mxu2 %v223_v36  ;;  %v203_v55 = vld [vmem:[%s689_s1 + $0x90] sm:$0xff]  ;;  %v234_v58 = vld [vmem:[%s689_s1 + $0x188] sm:$0xff]  ;;  %v217_v60 = vld [vmem:[%s689_s1 + $0x100] sm:$0xff] }
  0x1f   : > { %284 = vmatpush.msra.mxu1 %v208_v35  ;;  %262 = vmatpush.msra.mxu0 %v191_v37  ;;  %v202_v59 = vld [vmem:[%s689_s1 + $0x88] sm:$0xff]  ;;  %v185_v61 = vld [vmem:[%s689_s1] sm:$0xff]  ;;  %v179_v62 = vld [vmem:[%s650_s6 + $0x10] sm:$0xff] }
  0x20   : > { %331 = vmatpush.msra.mxu3 %v239_v38  ;;  %309 = vmatpush.msra.mxu2 %v222_v40  ;;  %v233_v63 = vld [vmem:[%s689_s1 + $0x180] sm:$0xff]  ;;  %v180_v1 = vld [vmem:[%s650_s6 + $0x18] sm:$0xff]  ;;  %v178_v3 = vld [vmem:[%s650_s6 + $0x8] sm:$0xff] }
  0x21   : > { %285 = vmatpush.msra.mxu1 %v207_v39  ;;  %263 = vmatpush.msra.mxu0 %v190_v41  ;;  %v177_v0 = vld [vmem:[%s650_s6] sm:$0xff]  ;;  %v183_v4 = vld [vmem:[%s650_s6 + $0x30] sm:$0xff]  ;;  %v184_v6 = vld [vmem:[%s650_s6 + $0x38] sm:$0xff] }
  0x22   : > { %332 = vmatpush.msra.mxu3 %v238_v42  ;;  %310 = vmatpush.msra.mxu2 %v221_v44  ;;  %v201_v2 = vld [vmem:[%s689_s1 + $0x80] sm:$0xff]  ;;  %v182_v7 = vld [vmem:[%s650_s6 + $0x28] sm:$0xff] }
  0x23   : > { %286 = vmatpush.msra.mxu1 %v206_v43  ;;  %264 = vmatpush.msra.mxu0 %v189_v45  ;;  %v181_v5 = vld [vmem:[%s650_s6 + $0x20] sm:$0xff] }
  0x24   : > { %333 = vmatpush.msra.mxu3 %v237_v46  ;;  %311 = vmatpush.msra.mxu2 %v220_v48  ;;  %v425_v8 = vld [vmem:[%s690_s2] ss:$0 sm:$0xff] }
  0x25   : > { %287 = vmatpush.msra.mxu1 %v205_v47  ;;  %265 = vmatpush.msra.mxu0 %v188_v49 }
  0x26   : > { %334 = vmatpush.msra.mxu3 %v236_v50  ;;  %312 = vmatpush.msra.mxu2 %v219_v52 }
  0x27   : > { %288 = vmatpush.msra.mxu1 %v204_v51  ;;  %266 = vmatpush.msra.mxu0 %v187_v53 }
  0x28   : > { %335 = vmatpush.msra.mxu3 %v235_v54  ;;  %313 = vmatpush.msra.mxu2 %v218_v56 }
  0x29   : > { %289 = vmatpush.msra.mxu1 %v203_v55  ;;  %267 = vmatpush.msra.mxu0 %v186_v57 }
  0x2a   : > { %336 = vmatpush.msra.mxu3 %v234_v58  ;;  %314 = vmatpush.msra.mxu2 %v217_v60 }
  0x2b   : > { %290 = vmatpush.msra.mxu1 %v202_v59  ;;  %268 = vmatpush.msra.mxu0 %v185_v61 }
  0x2c   : > { %315 = vmatmul.f32.vlgmr.msra.gmra.mxu2 %v179_v62  ;;  %337 = vmatpush.msra.mxu3 %v233_v63 }
  0x2d   : > { %269 = vmatmul.f32.vlgmr.msra.gmra.mxu0 %v177_v0  ;;  %338 = vmatmul.f32.vlgmr.msra.gmra.mxu3 %v180_v1 }
  0x2e   : > { %291 = vmatpush.msra.mxu1 %v201_v2 }
  0x2f   : > { %292 = vmatmul.f32.vlgmr.msra.gmra.mxu1 %v178_v3 }
  0x34   : > { %318 = vmatmul.f32.gmra.mxu2 %v183_v4 }
  0x35   : > { %272 = vmatmul.f32.gmra.mxu0 %v181_v5  ;;  %341 = vmatmul.f32.gmra.mxu3 %v184_v6 }
  0x37   : > { %295 = vmatmul.f32.gmra.mxu1 %v182_v7 }
  0xaa   : > { %v270_v9 = vpop.f32.mrf.mxu0 }
  0xab   : > { %v271_v10 = vadd.f32 %v425_v8, %v270_v9 }
  0xac   : > { %v293_v11 = vpop.f32.mrf.mxu1 }
  0xad   : > { %v294_v12 = vadd.f32 %v293_v11, %v271_v10 }
  0xaf   : > { %v316_v13 = vpop.f32.mrf.mxu2 }
  0xb0   : > { %v317_v14 = vadd.f32 %v316_v13, %v294_v12  ;;  %v339_v15 = vpop.f32.mrf.mxu3 }
  0xb2   : > { %v340_v16 = vadd.f32 %v339_v15, %v317_v14  ;;  %v273_v17 = vpop.f32.mrf.mxu0 }
  0xb3   : > { %v274_v18 = vadd.f32 %v425_v8, %v273_v17 }
  0xb4   : > { %346 = vst.msk [vmem:[%s175_s27] sm:$0xff] %vm345_vm0, %v340_v16  ;;  %v296_v19 = vpop.f32.mrf.mxu1 }
  0xb5   : > { %v297_v20 = vadd.f32 %v296_v19, %v274_v18 }
  0xb7   : > { %v319_v21 = vpop.f32.mrf.mxu2 }
  0xb8   : > { %v320_v22 = vadd.f32 %v319_v21, %v297_v20  ;;  %v342_v23 = vpop.f32.mrf.mxu3 }
  0xba   : > { %v343_v24 = vadd.f32 %v342_v23, %v320_v22 }
  0xbc   : > { %347 = vst.msk [vmem:[%s175_s27 + $0x8] sm:$0xff] %vm345_vm0, %v343_v24 }
  0xbd PF: > { %s13_s12 = sadd.s32 1, %s432_s12  }
  0xbe   : > { %p10_p4 = scmp.ge.s32.totalorder %s13_s12, 4  }
  0xc0   :  { %12 = sbr.rel (!%p10_p4) target bundleno = 1 (0x1), region = 62 }

</bundles_post_ra>
